<compile_context>
chip_gen: v7x
topology: tpu7x:2x2x1
jax: 0.10.0
libtpu: 0.0.40
codegen_flags: <defaults>
</compile_context>

<pallas_src>
import functools
import math

import jax
import jax.numpy as jnp
from jax import lax
from jax.experimental import pallas as pl
from jax.experimental.pallas import tpu as pltpu


def _round_up(a, b):
    return ((a + b - 1) // b) * b


def _vmem_capacity_bytes():
    """Physical VMEM per core (v5e/v6e: 128 MiB, v7x: 64 MiB); safe fallback."""
    try:
        info = pltpu.get_tpu_info()
        cap = int(getattr(info, "vmem_capacity_bytes", 0) or 0)
        if cap > 0:
            return cap
    except Exception:
        pass
    return 64 * 1024 * 1024          # assume the smallest (v7x) -> always safe


def _conv_kernel(x_ref, w_ref, b_ref, o_ref, *, th, qw, kc, cp):
    """One output row tile = a single MXU matmul + bias + cast + dense store.

    x_ref: (1, TH, Qw, Kc)   im2col'ed input tile (Kc = Km*Km*Cin), bf16
    w_ref: (Kc, Cp)          phase-merged / flipped / pre-scaled weight, bf16
    b_ref: (1, Cp)           phase-tiled bias, f32
    o_ref: (1, TH, Qw, Cp)   output row tile (lane dense: Cp % 128 == 0), bf16
    """
    lhs = x_ref[...].reshape(th * qw, kc)      # Qw % 8 == 0 -> free dim merge
    acc = jnp.dot(lhs, w_ref[...], preferred_element_type=jnp.float32)
    acc = acc + b_ref[...]                     # one (1, Cp) broadcast per tile
    o_ref[0] = acc.astype(o_ref.dtype).reshape(th, qw, cp)   # one dense store


@functools.partial(jax.jit, static_argnames=("stride", "padding", "compute_dtype"))
def equal_conv_transpose2d(x, weight, bias=None, stride=1, padding=0,
                           compute_dtype=jnp.bfloat16):
    """x: (N, Cin, H, W) NCHW.  weight: (Cin, Cout, K, K).  bias: (Cout,) or None."""
    N, Cin, H, W = x.shape
    Cin_w, Cout, K, K2 = weight.shape
    assert Cin_w == Cin and K == K2
    s, p = int(stride), int(padding)
    scale = 1.0 / math.sqrt(Cin * K * K)

    Ho = (H - 1) * s - 2 * p + K
    Wo = (W - 1) * s - 2 * p + K
    Km = -(-K // s)                                   # ceil(K / s)

    # ---- phase-merged, flipped, scaled weight: (Km*Km*Cin, Cp) -------------
    # w_ph[j, k, ci, dh, dw, co] = scale * W[ci, co, dh + s*(Km-1-j), dw + s*(Km-1-k)]
    wt = jnp.transpose(weight, (2, 3, 0, 1)).astype(jnp.float32) * scale   # (K,K,Cin,Cout)
    wt = jnp.pad(wt, ((0, s * Km - K), (0, s * Km - K), (0, 0), (0, 0)))
    wt = wt.reshape(Km, s, Km, s, Cin, Cout)
    wt = jnp.flip(wt, axis=(0, 2))                    # bake in the spatial flip
    w_ph = jnp.transpose(wt, (0, 2, 4, 1, 3, 5))      # (Km, Km, Cin, s, s, Cout)

    Kc = Km * Km * Cin                                # fused contraction depth
    Ce = s * s * Cout
    Cp = _round_up(Ce, 128)                           # lane-dense output channels
    w2 = w_ph.reshape(Kc, Ce)
    if Cp != Ce:
        w2 = jnp.pad(w2, ((0, 0), (0, Cp - Ce)))
    w2 = w2.astype(compute_dtype)

    b = bias if bias is not None else jnp.zeros((Cout,), jnp.float32)
    b_ph = jnp.tile(b.astype(jnp.float32), (s * s,))
    b_ph = jnp.pad(b_ph, (0, Cp - Ce)).reshape(1, Cp)

    # ---- geometry + per-generation tile sizing ------------------------------
    Qh = H + Km - 1                                   # un-shuffled output rows
    Qw = W + Km - 1
    Qw_pad = _round_up(Qw, 8)                         # keeps in-kernel reshapes free

    bytes_c = jnp.dtype(compute_dtype).itemsize
    Kc_lane = _round_up(Kc, 128)                      # VMEM lane padding of x tile
    cap = _vmem_capacity_bytes()
    budget = max(int(0.45 * cap), 8 << 20)            # tile budget with headroom
    # Fixed VMEM: double-buffered weight + bias blocks (+ small margin).
    fixed = 2 * _round_up(Kc, 16) * Cp * bytes_c + 2 * 8 * Cp * 4 + (2 << 20)
    # Per un-shuffled output row: double-buffered input & output blocks,
    # the f32 matmul result, and the bf16 LHS temporary (all lane-padded).
    per_row = Qw_pad * (2 * Kc_lane * bytes_c          # x tile  (2 buffers)
                        + 2 * Cp * bytes_c             # out tile (2 buffers, bf16)
                        + Cp * 4                       # f32 MXU result
                        + Kc_lane * bytes_c)           # LHS temp (conservative)
    rows_budget = max(1, (budget - fixed) // per_row)
    nt = max(1, -(-Qh // rows_budget))                 # number of row tiles
    if N == 1 and Qh >= 2:
        nt = max(nt, 2)        # >= 2 parallel grid steps keeps both v7x TCs busy
    nt = min(nt, Qh)
    TH = -(-Qh // nt)
    Qh_pad = nt * TH
    Hp = Qh_pad + Km - 1
    Wp = Qw_pad + Km - 1

    # ---- wrapper-side im2col: stack the Km^2 shifted views on channels ------
    # x_stack[n, q, w, (jh, jw, ci)] = x_pad[n, q + jh, w + jw, ci]
    # (pad + slices + concat fuse into one XLA pass under this jit; extra HBM
    #  traffic is Km^2 * input bytes = Km^2*Cin/Cp of the output traffic.)
    x_nhwc = jnp.transpose(x, (0, 2, 3, 1)).astype(compute_dtype)
    x_pad = jnp.pad(
        x_nhwc,
        ((0, 0), (Km - 1, Hp - (Km - 1) - H), (Km - 1, Wp - (Km - 1) - W), (0, 0)))
    x_stack = jnp.concatenate(
        [x_pad[:, jh:jh + Qh_pad, jw:jw + Qw_pad, :]
         for jh in range(Km) for jw in range(Km)],
        axis=-1)                                       # (N, Qh_pad, Qw_pad, Kc)

    # ---- pallas_call ---------------------------------------------------------
    est_vmem = fixed + TH * per_row
    vmem_limit = int(min(int(0.9 * cap), max(2 * est_vmem, 32 << 20)))

    flops = 2 * N * Qh_pad * Qw_pad * Kc * Cp
    bytes_accessed = int(N * Qh_pad * Qw_pad * Kc * bytes_c      # x_stack read
                         + Kc * Cp * bytes_c + Cp * 4            # weight + bias
                         + N * Qh_pad * Qw_pad * Cp * bytes_c)   # bf16 output

    kernel = functools.partial(_conv_kernel, th=TH, qw=Qw_pad, kc=Kc, cp=Cp)

    o_all = pl.pallas_call(
        kernel,
        out_shape=jax.ShapeDtypeStruct((N, Qh_pad, Qw_pad, Cp), compute_dtype),
        grid=(N, nt),
        in_specs=[
            pl.BlockSpec((1, TH, Qw_pad, Kc), lambda n, t: (n, t, 0, 0)),
            pl.BlockSpec((Kc, Cp), lambda n, t: (0, 0)),
            pl.BlockSpec((1, Cp), lambda n, t: (0, 0)),
        ],
        out_specs=pl.BlockSpec((1, TH, Qw_pad, Cp), lambda n, t: (n, t, 0, 0)),
        compiler_params=pltpu.CompilerParams(
            dimension_semantics=("parallel", "parallel"),
            vmem_limit_bytes=vmem_limit),
        cost_estimate=pl.CostEstimate(flops=flops, transcendentals=0,
                                      bytes_accessed=bytes_accessed),
    )(x_stack, w2, b_ph)

    # ---- pixel shuffle (interleave phases), crop `padding`, back to NCHW ----
    o = o_all[..., :Ce].reshape(N, Qh_pad, Qw_pad, s, s, Cout)
    o = jnp.transpose(o, (0, 1, 3, 2, 4, 5)).reshape(N, s * Qh_pad, s * Qw_pad, Cout)
    o = o[:, p:p + Ho, p:p + Wo, :]
    return jnp.transpose(o, (0, 3, 1, 2)).astype(x.dtype)


def _reference(x, weight, bias, stride, padding, compute_dtype=jnp.bfloat16):
    """conv_transpose2d via lax.conv_general_dilated, same bf16 operands, f32 acc."""
    Cin, Cout, K, _ = weight.shape
    scale = 1.0 / math.sqrt(Cin * K * K)
    w_oihw = (jnp.transpose(weight, (1, 0, 2, 3)) * scale)[:, :, ::-1, ::-1]
    out = lax.conv_general_dilated(
        x.astype(compute_dtype), w_oihw.astype(compute_dtype),
        window_strides=(1, 1),
        padding=[(K - 1 - padding, K - 1 - padding)] * 2,
        lhs_dilation=(stride, stride),
        dimension_numbers=("NCHW", "OIHW", "NCHW"),
        preferred_element_type=jnp.float32,
    )
    if bias is not None:
        out = out + bias.reshape(1, Cout, 1, 1)
    return out.astype(x.dtype)


def _check(key, N, Cin, H, W, Cout, K, stride, padding, use_bias=True):
    k_x, k_w, k_b = jax.random.split(key, 3)
    x = jax.random.normal(k_x, (N, Cin, H, W), jnp.float32)
    weight = jax.random.normal(k_w, (Cin, Cout, K, K), jnp.float32)
    bias = 0.1 * jax.random.normal(k_b, (Cout,), jnp.float32) if use_bias else None

    out = jax.block_until_ready(
        equal_conv_transpose2d(x, weight, bias, stride=stride, padding=padding))
    expected = (N, Cout, (H - 1) * stride - 2 * padding + K,
                (W - 1) * stride - 2 * padding + K)
    assert out.shape == expected, (out.shape, expected)

    ref = jax.block_until_ready(_reference(x, weight, bias, stride, padding))
    # Kernel stores its result in bf16 (to halve output HBM traffic), so the
    # comparison against the f32-stored reference carries up to ~1 bf16 ulp
    # (~4e-3 relative) of extra rounding on top of bf16-operand error.
    err = float(jnp.max(jnp.abs(out - ref)))
    assert jnp.allclose(out, ref, rtol=2e-2, atol=2e-2), err
    return err


if __name__ == "__main__":
    key = jax.random.PRNGKey(0)
    k1, k2, k3 = jax.random.split(key, 3)

    # Main config (the module's typical GAN-upsample usage, small sizes).
    _check(k1, N=2, Cin=4, H=16, W=16, Cout=8, K=3, stride=2, padding=1)
    # stride=1 path (Km=K, plain correlation, odd contraction depth).
    _check(k2, N=1, Cin=3, H=5, W=5, Cout=2, K=3, stride=1, padding=0)
    # stride > K path (Km=1, some phases bias-only), no-bias branch.
    _check(k3, N=1, Cin=2, H=4, W=4, Cout=3, K=3, stride=3, padding=0,
           use_bias=False)

    print("KERNEL_OK")
</pallas_src>

<mosaic_0001>
module attributes {stable_mosaic.version = 11 : i64} {
  func.func @_conv_kernel(%arg0: i32, %arg1: i32, %arg2: memref<1x17x24x16xbf16, #tpu.memory_space<vmem>>, %arg3: memref<16x128xbf16, #tpu.memory_space<vmem>>, %arg4: memref<1x128xf32, #tpu.memory_space<vmem>>, %arg5: memref<1x17x24x128xbf16, #tpu.memory_space<vmem>>) attributes {dimension_semantics = [#tpu.dimension_semantics<parallel>, #tpu.dimension_semantics<parallel>], iteration_bounds = array<i64: 2, 1>, scalar_prefetch = 0 : i64, scratch_operands = 0 : i64, tpu.core_type = #tpu.core_type<tc>, window_params = [{transform_indices = @transform_0, window_bounds = array<i64: 1, 17, 24, 16>}, {pipeline_mode = #tpu.pipeline_mode<synchronous>, transform_indices = @transform_1, window_bounds = array<i64: 16, 128>}, {pipeline_mode = #tpu.pipeline_mode<synchronous>, transform_indices = @transform_2, window_bounds = array<i64: 1, 128>}, {transform_indices = @transform_3, window_bounds = array<i64: 1, 17, 24, 128>}]} {
    %c0 = arith.constant 0 : index
    %c0_0 = arith.constant 0 : index
    %c0_1 = arith.constant 0 : index
    %c0_2 = arith.constant 0 : index
    %0 = vector.load %arg2[%c0, %c0_0, %c0_1, %c0_2] : memref<1x17x24x16xbf16, #tpu.memory_space<vmem>>, vector<1x17x24x16xbf16>
    %1 = vector.shape_cast %0 : vector<1x17x24x16xbf16> to vector<408x16xbf16>
    %c0_3 = arith.constant 0 : index
    %c0_4 = arith.constant 0 : index
    %2 = vector.load %arg3[%c0_3, %c0_4] : memref<16x128xbf16, #tpu.memory_space<vmem>>, vector<16x128xbf16>
    %cst = arith.constant dense<0.000000e+00> : vector<408x128xf32>
    %3 = tpu.matmul %1, %2, %cst {dimension_numbers = #tpu.dot_dimension_numbers<[1], [0], [0], [1], [0, 0, 1, 1], [], []>} : vector<408x16xbf16>, vector<16x128xbf16>, vector<408x128xf32> -> vector<408x128xf32>
    %c0_5 = arith.constant 0 : index
    %c0_6 = arith.constant 0 : index
    %4 = vector.load %arg4[%c0_5, %c0_6] : memref<1x128xf32, #tpu.memory_space<vmem>>, vector<1x128xf32>
    %5 = vector.broadcast %4 : vector<1x128xf32> to vector<408x128xf32>
    %6 = arith.addf %3, %5 : vector<408x128xf32>
    %7 = arith.truncf %6 : vector<408x128xf32> to vector<408x128xbf16>
    %8 = vector.shape_cast %7 : vector<408x128xbf16> to vector<17x24x128xbf16>
    %c0_7 = arith.constant 0 : index
    %c0_8 = arith.constant 0 : index
    %c0_9 = arith.constant 0 : index
    %c0_10 = arith.constant 0 : index
    %9 = vector.load %arg5[%c0_7, %c0_8, %c0_9, %c0_10] : memref<1x17x24x128xbf16, #tpu.memory_space<vmem>>, vector<1x17x24x128xbf16>
    %10 = vector.shape_cast %9 : vector<1x17x24x128xbf16> to vector<17x24x128xbf16>
    %11 = vector.shape_cast %8 : vector<17x24x128xbf16> to vector<1x17x24x128xbf16>
    tpu.vector_store %arg5[%c0_7, %c0_8, %c0_9, %c0_10], %11 {strides = array<i32>} : memref<1x17x24x128xbf16, #tpu.memory_space<vmem>>, vector<1x17x24x128xbf16>,
    return
  }
  func.func @transform_0(%arg0: i32, %arg1: i32) -> (i32, i32, i32, i32) {
    %c0_i32 = arith.constant 0 : i32
    %c0_i32_0 = arith.constant 0 : i32
    %c0_i32_1 = arith.constant 0 : i32
    return %arg0, %arg1, %c0_i32, %c0_i32_0 : i32, i32, i32, i32
  }
  func.func @transform_1(%arg0: i32, %arg1: i32) -> (i32, i32) {
    %c0_i32 = arith.constant 0 : i32
    %c0_i32_0 = arith.constant 0 : i32
    %c0_i32_1 = arith.constant 0 : i32
    return %c0_i32, %c0_i32_0 : i32, i32
  }
  func.func @transform_2(%arg0: i32, %arg1: i32) -> (i32, i32) {
    %c0_i32 = arith.constant 0 : i32
    %c0_i32_0 = arith.constant 0 : i32
    %c0_i32_1 = arith.constant 0 : i32
    return %c0_i32, %c0_i32_0 : i32, i32
  }
  func.func @transform_3(%arg0: i32, %arg1: i32) -> (i32, i32, i32, i32) {
    %c0_i32 = arith.constant 0 : i32
    %c0_i32_0 = arith.constant 0 : i32
    %c0_i32_1 = arith.constant 0 : i32
    return %arg0, %arg1, %c0_i32, %c0_i32_0 : i32, i32, i32, i32
  }
}

</mosaic_0001>

<bundles_post_ra>
// kernel: tile.8
= control target key start
LH: loop header
LB: loop body
LE: loop exit
PB: predicated region body
PF: predicated region fallthrough
CT: control target
= control target key end

     0   :  { %s22_s0 = inlined_call_operand.vmem [shape: f32[8], index: 0, kind: input, shape index: {}]   ;;  %s23_s1 = inlined_call_operand.vmem [shape: f32[4,8], index: 1, kind: output, shape index: {}]  }
   0x1   :  { %v4_v0 = vld [vmem:[%s22_s0] ss:$0 sm:$0xff] }
   0x2   :  { %5 = vst [vmem:[%s23_s1] sm:$0xf] %v4_v0 }

// kernel: tile.9
= control target key start
LH: loop header
LB: loop body
LE: loop exit
PB: predicated region body
PF: predicated region fallthrough
CT: control target
= control target key end

     0   :  { %vm7_vm0 = vcmask 64512   ;;  %s37_s8 = smov 8   ;;  %s38_s9 = smov 16   ;;  %vm13_vm1 = vcmask 261312   ;;  %vm19_vm2 = vcmask 195712   ;;  %vm25_vm3 = vcmask 130112   ;;  %s55_s0 = inlined_call_operand.vmem [shape: f32[4,8], index: 0, kind: input, shape index: {}]   ;;  %s56_s1 = inlined_call_operand.vmem [shape: f32[32], index: 1, kind: output, shape index: {}]  }
   0x1   :  { %v4_v0 = vld [vmem:[%s55_s0] sm:$0xf]  ;;  %s36_s0 = smov 24  }
   0x2   :  { %5 = vst [vmem:[#allocation1] sm:$0xf] %v4_v0 }
   0x9   :  { %v10_v1 = vld [vmem:[#allocation1 + $0x3] sm:$0x1]   ;;  %v22_v2 = vld [vmem:[#allocation1 + $0x1] sm:$0x1]   ;;  %v6_v3 = vld [vmem:[#allocation1] sm:$0x1]  }
   0xa   :  { %11 = vrot.lane.b32.xlu0 %v10_v1, %s36_s0  ;;  %23 = vrot.lane.b32.xlu1 %v22_v2, %s37_s8  ;;  %v16_v4 = vld [vmem:[#allocation1 + $0x2] sm:$0x1]   ;;  %8 = vst.msk [vmem:[#allocation0] sm:$0x1] %vm7_vm0, %v6_v3  }
   0xe   :  { %17 = vrot.lane.b32.xlu0 %v16_v4, %s38_s9 }
  0x7c   :  { %v12_v5 = vpop.permute.xlu0 %11   ;;  %v24_v6 = vpop.permute.xlu1 %23  }
  0x7d   :  { %14 = vst.msk [vmem:[#allocation0] sm:$0x1] %vm13_vm1, %v12_v5  }
  0x80   :  { %v18_v7 = vpop.permute.xlu0 %17  }
  0x81   :  { %20 = vst.msk [vmem:[#allocation0] sm:$0x1] %vm19_vm2, %v18_v7  }
  0x82   :  { %26 = vst.msk [vmem:[#allocation0] sm:$0x1] %vm25_vm3, %v24_v6  }
  0x89   :  { %v30_v8 = vld [vmem:[#allocation0] sm:$0x1] }
  0x8a   :  { %32 = vst [vmem:[%s56_s1] sm:$0x1] %v30_v8 }

// kernel: equal_conv_transpose2d.1
= control target key start
LH: loop header
LB: loop body
LE: loop exit
PB: predicated region body
PF: predicated region fallthrough
CT: control target
= control target key end

     0   :  { %s1574_s12 = smov 0   ;;  %s1576_s13 = smov 0   ;;  %s1755_s0 = inlined_call_operand.vmem [shape: bf16[2,17,24,16], index: 0, kind: input, shape index: {}]   ;;  %s1756_s1 = inlined_call_operand.vmem [shape: bf16[16,128], index: 1, kind: input, shape index: {}]   ;;  %s1757_s2 = inlined_call_operand.vmem [shape: f32[1,128], index: 2, kind: input, shape index: {}]   ;;  %s1758_s3 = inlined_call_operand.vmem [shape: bf16[2,17,24,128], index: 3, kind: output, shape index: {}]  }
   0x1   :  { %s1578_s14 = smov 0  }
   0x2 LB: > { %s25_s15 = sadd.s32 1, %s1548_s13  ;;  %p1085_p0 = scmp.ge.s32.totalorder %s1552_s14, 1  ;;  %s1552_s14 = sphi %s1578_s14, %s13_s14   ;;  %s1548_s13 = sphi %s1576_s13, %s1760_s13   ;;  %s1544_s12 = sphi %s1574_s12, %s1759_s12  }
   0x3   : > { %p27_p1 = scmp.ge.s32.totalorder %s25_s15, 2  ;;  %p159_p2 = scmp.lt.s32.totalorder %s1552_s14, 3 }
   0x5   : > { %s1762_s15 = smov (%p27_p1, %s25_s15), 0  ;;  %p160_p3 = pnand %p1085_p0, %p159_p2 }
   0x6   : > { %v1503_v0 = vld [vmem:[%s1756_s1] sm:$0xff] (!%p160_p3)   ;;  %p194_p4 = scmp.lt.s32.totalorder (!%p160_p3), %s1544_s12, 1  ;;  %vm410_vm0 = vcmask (!%p160_p3), 130048  }
   0x7   : > { %163 = sbr.rel (%p160_p3) target bundleno = 288 (0x120), region = 32  ;;  %1422 = vmatprep.subr.bf16.mxu0 (!%p160_p3), %v1503_v0  ;;  %1476 = vmatprep.subr.bf16.mxu1 (!%p160_p3), %v1503_v0  ;;  %v1660_v28 = vld [vmem:[%s1757_s2] ss:$0 sm:$0xff] (!%p160_p3) }
   0x8   : > { %1423 = vmatpush3.bf16.msra.mxu0 (!%p160_p3), %v1503_v0  ;;  %1477 = vmatpush3.bf16.msra.mxu1 (!%p160_p3), %v1503_v0 }
   0xe   : > { %s1764_s12 = smov (!%p194_p4, %s1544_s12), 1 }
   0xf   : > { %s1478_s18 = smul.u32 204, %s1764_s12 }
  0x11   : > { %s1603_s21 = scalar_lea.vmem %s1755_s0, %s1478_s18  ;;  %s1671_s26 = scalar_lea.vmem %s1758_s3, %s1478_s18 }
  0x12   : > { %v1504_v1 = vld [vmem:[%s1603_s21] sm:$0xff]   ;;  %v1505_v2 = vld [vmem:[%s1603_s21 + $0x8] sm:$0xff]   ;;  %v1506_v3 = vld [vmem:[%s1603_s21 + $0x70] sm:$0xff]  }
  0x13   : > { %1424 = vmatprep.mubr.msk.bf16.mxu0 %vm410_vm0, %v1504_v1  ;;  %v1507_v4 = vld [vmem:[%s1603_s21 + $0x78] sm:$0xff]   ;;  %1452 = vmatprep.mubr.msk.bf16.mxu1 %vm410_vm0, %v1506_v3  ;;  %v1508_v5 = vld [vmem:[%s1603_s21 + $0x10] sm:$0xff]   ;;  %v1510_v6 = vld [vmem:[%s1603_s21 + $0x80] sm:$0xff]  }
  0x14   : > { %1425 = vmatmul.mubr.msk.bf16.vlgmr.msra.gmra.mrb[0].mxu0 %vm410_vm0, %v1505_v2  ;;  %1453 = vmatmul.mubr.msk.bf16.vlgmr.msra.gmra.mrb[0].mxu1 %vm410_vm0, %v1507_v4  ;;  %v1509_v7 = vld [vmem:[%s1603_s21 + $0x18] sm:$0xff]   ;;  %v1512_v8 = vld [vmem:[%s1603_s21 + $0x20] sm:$0xff]   ;;  %v1511_v9 = vld [vmem:[%s1603_s21 + $0x88] sm:$0xff]  }
  0x15   : > { %1428 = vmatprep.mubr.msk.bf16.mxu0 %vm410_vm0, %v1508_v5  ;;  %1456 = vmatprep.mubr.msk.bf16.mxu1 %vm410_vm0, %v1510_v6  ;;  %v1514_v10 = vld [vmem:[%s1603_s21 + $0x90] sm:$0xff]   ;;  %v1513_v11 = vld [vmem:[%s1603_s21 + $0x28] sm:$0xff]   ;;  %v1515_v13 = vld [vmem:[%s1603_s21 + $0x98] sm:$0xff]  }
  0x16   : > { %v1516_v12 = vld [vmem:[%s1603_s21 + $0x30] sm:$0xff]   ;;  %v1518_v14 = vld [vmem:[%s1603_s21 + $0xa0] sm:$0xff]   ;;  %v1517_v15 = vld [vmem:[%s1603_s21 + $0x38] sm:$0xff]  }
  0x17   : > { %v1520_v16 = vld [vmem:[%s1603_s21 + $0x40] sm:$0xff]   ;;  %v1519_v17 = vld [vmem:[%s1603_s21 + $0xa8] sm:$0xff]   ;;  %v1522_v18 = vld [vmem:[%s1603_s21 + $0xb0] sm:$0xff]  }
  0x18   : > { %v1521_v19 = vld [vmem:[%s1603_s21 + $0x48] sm:$0xff]   ;;  %v1524_v20 = vld [vmem:[%s1603_s21 + $0x50] sm:$0xff]   ;;  %v1523_v21 = vld [vmem:[%s1603_s21 + $0xb8] sm:$0xff]  }
  0x19   : > { %v1526_v22 = vld [vmem:[%s1603_s21 + $0xc0] sm:$0xff]   ;;  %v1525_v23 = vld [vmem:[%s1603_s21 + $0x58] sm:$0xff]   ;;  %v1527_v25 = vld [vmem:[%s1603_s21 + $0xc8] ss:$0 sps:$4 sm:$0xff]  }
  0x1a   : > { %v1528_v24 = vld [vmem:[%s1603_s21 + $0x60] sm:$0xff]   ;;  %v1529_v26 = vld [vmem:[%s1603_s21 + $0x68] sm:$0xff]  }
  0x1c   : > { %1429 = vmatmul.mubr.msk.bf16.gmra.mrb[4].mxu0 %vm410_vm0, %v1509_v7  ;;  %1457 = vmatmul.mubr.msk.bf16.gmra.mrb[4].mxu1 %vm410_vm0, %v1511_v9 }
  0x1d   : > { %1432 = vmatprep.mubr.msk.bf16.mxu0 %vm410_vm0, %v1512_v8  ;;  %1460 = vmatprep.mubr.msk.bf16.mxu1 %vm410_vm0, %v1514_v10 }
  0x24   : > { %1433 = vmatmul.mubr.msk.bf16.gmra.mrb[8].mxu0 %vm410_vm0, %v1513_v11  ;;  %1461 = vmatmul.mubr.msk.bf16.gmra.mrb[8].mxu1 %vm410_vm0, %v1515_v13 }
  0x25   : > { %1436 = vmatprep.mubr.msk.bf16.mxu0 %vm410_vm0, %v1516_v12  ;;  %1464 = vmatprep.mubr.msk.bf16.mxu1 %vm410_vm0, %v1518_v14 }
  0x2c   : > { %1437 = vmatmul.mubr.msk.bf16.gmra.mrb[12].mxu0 %vm410_vm0, %v1517_v15  ;;  %1465 = vmatmul.mubr.msk.bf16.gmra.mrb[12].mxu1 %vm410_vm0, %v1519_v17 }
  0x2d   : > { %1440 = vmatprep.mubr.msk.bf16.mxu0 %vm410_vm0, %v1520_v16  ;;  %1468 = vmatprep.mubr.msk.bf16.mxu1 %vm410_vm0, %v1522_v18 }
  0x34   : > { %1441 = vmatmul.mubr.msk.bf16.gmra.mrb[16].mxu0 %vm410_vm0, %v1521_v19  ;;  %1469 = vmatmul.mubr.msk.bf16.gmra.mrb[16].mxu1 %vm410_vm0, %v1523_v21 }
  0x35   : > { %1444 = vmatprep.mubr.msk.bf16.mxu0 %vm410_vm0, %v1524_v20  ;;  %1472 = vmatprep.mubr.msk.bf16.mxu1 %vm410_vm0, %v1526_v22 }
  0x3c   : > { %1445 = vmatmul.mubr.msk.bf16.gmra.mrb[20].mxu0 %vm410_vm0, %v1525_v23  ;;  %1473 = vmatmul.mubr.msk.bf16.gmra.mrb[20].mxu1 %vm410_vm0, %v1527_v25 }
  0x3d   : > { %1448 = vmatprep.mubr.msk.bf16.mxu0 %vm410_vm0, %v1528_v24 }
  0x44   : > { %1449 = vmatmul.mubr.msk.bf16.gmra.mrb[24].mxu0 %vm410_vm0, %v1529_v26 }
  0xe7   : > { %v1426_v27 = vpop.f32.mrb[0].mxu0  ;;  %v1454_v31 = vpop.f32.mrb[0].mxu1 }
  0xe8   : > { %v523_v29 = vpop.f32.mrb[1].mxu0  ;;  %v532_v32 = vadd.f32 %v1426_v27, %v1660_v28  ;;  %v644_v35 = vadd.f32 %v1454_v31, %v1660_v28  ;;  %v635_v36 = vpop.f32.mrb[1].mxu1 }
  0xe9   : > { %v1427_v30 = vpop.f32.mrb[2].mxu0  ;;  %v524_v37 = vadd.f32 %v1660_v28, %v523_v29  ;;  %v636_v39 = vadd.f32 %v1660_v28, %v635_v36  ;;  %v1455_v40 = vpop.f32.mrb[2].mxu1 }
  0xea   : > { %v535_v33 = vadd.f32 %v1427_v30, %v1660_v28  ;;  %v526_v34 = vpop.f32.mrb[3].mxu0  ;;  %v647_v42 = vadd.f32 %v1455_v40, %v1660_v28  ;;  %v638_v43 = vpop.f32.mrb[3].mxu1 }
  0xeb   : > { %v527_v38 = vadd.f32 %v1660_v28, %v526_v34  ;;  %v639_v45 = vadd.f32 %v1660_v28, %v638_v43 }
  0xec   : > { %v1254_v41 = vpack.c.bf16 %v535_v33, %v532_v32  ;;  %v1324_v46 = vpack.c.bf16 %v647_v42, %v644_v35 }
  0xed   : > { %v1249_v44 = vpack.c.bf16 %v527_v38, %v524_v37  ;;  %v1319_v48 = vpack.c.bf16 %v639_v45, %v636_v39 }
  0xee   : > { %1371 = vst [vmem:[%s1671_s26 + $0x8] sm:$0xff] %v1254_v41   ;;  %1385 = vst [vmem:[%s1671_s26 + $0x78] sm:$0xff] %v1324_v46  }
  0xef   : > { %1250 = vst [vmem:[%s1671_s26] sm:$0xff] %v1249_v44   ;;  %v1430_v47 = vpop.f32.mrb[4].mxu0  ;;  %1384 = vst [vmem:[%s1671_s26 + $0x70] sm:$0xff] %v1319_v48   ;;  %v1458_v51 = vpop.f32.mrb[4].mxu1 }
  0xf0   : > { %v539_v49 = vpop.f32.mrb[5].mxu0  ;;  %v548_v52 = vadd.f32 %v1430_v47, %v1660_v28  ;;  %v660_v55 = vadd.f32 %v1458_v51, %v1660_v28  ;;  %v651_v56 = vpop.f32.mrb[5].mxu1 }
  0xf1   : > { %v1431_v50 = vpop.f32.mrb[6].mxu0  ;;  %v540_v57 = vadd.f32 %v1660_v28, %v539_v49  ;;  %v652_v59 = vadd.f32 %v1660_v28, %v651_v56  ;;  %v1459_v60 = vpop.f32.mrb[6].mxu1 }
  0xf2   : > { %v551_v53 = vadd.f32 %v1431_v50, %v1660_v28  ;;  %v542_v54 = vpop.f32.mrb[7].mxu0  ;;  %v663_v62 = vadd.f32 %v1459_v60, %v1660_v28  ;;  %v654_v63 = vpop.f32.mrb[7].mxu1 }
  0xf3   : > { %v543_v58 = vadd.f32 %v1660_v28, %v542_v54  ;;  %v655_v1 = vadd.f32 %v1660_v28, %v654_v63 }
  0xf4   : > { %v1264_v61 = vpack.c.bf16 %v551_v53, %v548_v52  ;;  %v1334_v2 = vpack.c.bf16 %v663_v62, %v660_v55 }
  0xf5   : > { %v1259_v0 = vpack.c.bf16 %v543_v58, %v540_v57  ;;  %v1329_v4 = vpack.c.bf16 %v655_v1, %v652_v59 }
  0xf6   : > { %1373 = vst [vmem:[%s1671_s26 + $0x18] sm:$0xff] %v1264_v61   ;;  %1387 = vst [vmem:[%s1671_s26 + $0x88] sm:$0xff] %v1334_v2  }
  0xf7   : > { %1372 = vst [vmem:[%s1671_s26 + $0x10] sm:$0xff] %v1259_v0   ;;  %v1434_v3 = vpop.f32.mrb[8].mxu0  ;;  %1386 = vst [vmem:[%s1671_s26 + $0x80] sm:$0xff] %v1329_v4   ;;  %v1462_v7 = vpop.f32.mrb[8].mxu1 }
  0xf8   : > { %v555_v5 = vpop.f32.mrb[9].mxu0  ;;  %v564_v8 = vadd.f32 %v1434_v3, %v1660_v28  ;;  %v676_v11 = vadd.f32 %v1462_v7, %v1660_v28  ;;  %v667_v12 = vpop.f32.mrb[9].mxu1 }
  0xf9   : > { %v1435_v6 = vpop.f32.mrb[10].mxu0  ;;  %v556_v13 = vadd.f32 %v1660_v28, %v555_v5  ;;  %v668_v15 = vadd.f32 %v1660_v28, %v667_v12  ;;  %v1463_v16 = vpop.f32.mrb[10].mxu1 }
  0xfa   : > { %v567_v9 = vadd.f32 %v1435_v6, %v1660_v28  ;;  %v558_v10 = vpop.f32.mrb[11].mxu0  ;;  %v679_v18 = vadd.f32 %v1463_v16, %v1660_v28  ;;  %v670_v19 = vpop.f32.mrb[11].mxu1 }
  0xfb   : > { %v559_v14 = vadd.f32 %v1660_v28, %v558_v10  ;;  %v671_v21 = vadd.f32 %v1660_v28, %v670_v19 }
  0xfc   : > { %v1274_v17 = vpack.c.bf16 %v567_v9, %v564_v8  ;;  %v1344_v22 = vpack.c.bf16 %v679_v18, %v676_v11 }
  0xfd   : > { %v1269_v20 = vpack.c.bf16 %v559_v14, %v556_v13  ;;  %v1339_v24 = vpack.c.bf16 %v671_v21, %v668_v15 }
  0xfe   : > { %1375 = vst [vmem:[%s1671_s26 + $0x28] sm:$0xff] %v1274_v17   ;;  %1389 = vst [vmem:[%s1671_s26 + $0x98] sm:$0xff] %v1344_v22  }
  0xff   : > { %1374 = vst [vmem:[%s1671_s26 + $0x20] sm:$0xff] %v1269_v20   ;;  %v1438_v23 = vpop.f32.mrb[12].mxu0  ;;  %1388 = vst [vmem:[%s1671_s26 + $0x90] sm:$0xff] %v1339_v24   ;;  %v1466_v27 = vpop.f32.mrb[12].mxu1 }
 0x100   : > { %v571_v25 = vpop.f32.mrb[13].mxu0  ;;  %v580_v29 = vadd.f32 %v1438_v23, %v1660_v28  ;;  %v692_v32 = vadd.f32 %v1466_v27, %v1660_v28  ;;  %v683_v33 = vpop.f32.mrb[13].mxu1 }
 0x101   : > { %v1439_v26 = vpop.f32.mrb[14].mxu0  ;;  %v572_v34 = vadd.f32 %v1660_v28, %v571_v25  ;;  %v684_v36 = vadd.f32 %v1660_v28, %v683_v33  ;;  %v1467_v37 = vpop.f32.mrb[14].mxu1 }
 0x102   : > { %v583_v30 = vadd.f32 %v1439_v26, %v1660_v28  ;;  %v574_v31 = vpop.f32.mrb[15].mxu0  ;;  %v695_v39 = vadd.f32 %v1467_v37, %v1660_v28  ;;  %v686_v40 = vpop.f32.mrb[15].mxu1 }
 0x103   : > { %v575_v35 = vadd.f32 %v1660_v28, %v574_v31  ;;  %v687_v42 = vadd.f32 %v1660_v28, %v686_v40 }
 0x104   : > { %v1284_v38 = vpack.c.bf16 %v583_v30, %v580_v29  ;;  %v1354_v43 = vpack.c.bf16 %v695_v39, %v692_v32 }
 0x105   : > { %v1279_v41 = vpack.c.bf16 %v575_v35, %v572_v34  ;;  %v1349_v45 = vpack.c.bf16 %v687_v42, %v684_v36 }
 0x106   : > { %1377 = vst [vmem:[%s1671_s26 + $0x38] sm:$0xff] %v1284_v38   ;;  %1391 = vst [vmem:[%s1671_s26 + $0xa8] sm:$0xff] %v1354_v43  }
 0x107   : > { %1376 = vst [vmem:[%s1671_s26 + $0x30] sm:$0xff] %v1279_v41   ;;  %v1442_v44 = vpop.f32.mrb[16].mxu0  ;;  %1390 = vst [vmem:[%s1671_s26 + $0xa0] sm:$0xff] %v1349_v45   ;;  %v1470_v48 = vpop.f32.mrb[16].mxu1 }
 0x108   : > { %v587_v46 = vpop.f32.mrb[17].mxu0  ;;  %v596_v49 = vadd.f32 %v1442_v44, %v1660_v28  ;;  %v708_v52 = vadd.f32 %v1470_v48, %v1660_v28  ;;  %v699_v53 = vpop.f32.mrb[17].mxu1 }
 0x109   : > { %v1443_v47 = vpop.f32.mrb[18].mxu0  ;;  %v588_v54 = vadd.f32 %v1660_v28, %v587_v46  ;;  %v700_v56 = vadd.f32 %v1660_v28, %v699_v53  ;;  %v1471_v57 = vpop.f32.mrb[18].mxu1 }
 0x10a   : > { %v599_v50 = vadd.f32 %v1443_v47, %v1660_v28  ;;  %v590_v51 = vpop.f32.mrb[19].mxu0  ;;  %v711_v59 = vadd.f32 %v1471_v57, %v1660_v28  ;;  %v702_v60 = vpop.f32.mrb[19].mxu1 }
 0x10b   : > { %v591_v55 = vadd.f32 %v1660_v28, %v590_v51  ;;  %v703_v62 = vadd.f32 %v1660_v28, %v702_v60 }
 0x10c   : > { %v1294_v58 = vpack.c.bf16 %v599_v50, %v596_v49  ;;  %v1364_v63 = vpack.c.bf16 %v711_v59, %v708_v52 }
 0x10d   : > { %v1289_v61 = vpack.c.bf16 %v591_v55, %v588_v54  ;;  %v1359_v1 = vpack.c.bf16 %v703_v62, %v700_v56 }
 0x10e   : > { %1379 = vst [vmem:[%s1671_s26 + $0x48] sm:$0xff] %v1294_v58   ;;  %1393 = vst [vmem:[%s1671_s26 + $0xb8] sm:$0xff] %v1364_v63  }
 0x10f   : > { %1378 = vst [vmem:[%s1671_s26 + $0x40] sm:$0xff] %v1289_v61   ;;  %v1446_v0 = vpop.f32.mrb[20].mxu0  ;;  %1392 = vst [vmem:[%s1671_s26 + $0xb0] sm:$0xff] %v1359_v1   ;;  %v1474_v4 = vpop.f32.mrb[20].mxu1 }
 0x110   : > { %v603_v2 = vpop.f32.mrb[21].mxu0  ;;  %v612_v5 = vadd.f32 %v1446_v0, %v1660_v28  ;;  %v724_v8 = vadd.f32 %v1474_v4, %v1660_v28  ;;  %v715_v9 = vpop.f32.mrb[21].mxu1 }
 0x111   : > { %v1447_v3 = vpop.f32.mrb[22].mxu0  ;;  %v604_v10 = vadd.f32 %v1660_v28, %v603_v2  ;;  %v716_v12 = vadd.f32 %v1660_v28, %v715_v9  ;;  %v1475_v13 = vpop.f32.mrb[22].mxu1 }
 0x112   : > { %v615_v6 = vadd.f32 %v1447_v3, %v1660_v28  ;;  %v606_v7 = vpop.f32.mrb[23].mxu0  ;;  %v1245_v15 = vpack.c.bf16 %v724_v8, %v724_v8  ;;  %v718_v16 = vpop.f32.mrb[23].mxu1 }
 0x113   : > { %v607_v11 = vadd.f32 %v1660_v28, %v606_v7  ;;  %v719_v18 = vadd.f32 %v1660_v28, %v718_v16 }
 0x114   : > { %v1304_v14 = vpack.c.bf16 %v615_v6, %v612_v5  ;;  %984 = vst [vmem:[%s1671_s26 + $0xc8] sm:$0xf] %v1245_v15 }
 0x115   : > { %v1299_v17 = vpack.c.bf16 %v607_v11, %v604_v10  ;;  %v1369_v20 = vpack.c.bf16 %v719_v18, %v716_v12 }
 0x116   : > { %1381 = vst [vmem:[%s1671_s26 + $0x58] sm:$0xff] %v1304_v14  }
 0x117   : > { %1380 = vst [vmem:[%s1671_s26 + $0x50] sm:$0xff] %v1299_v17   ;;  %v1450_v19 = vpop.f32.mrb[24].mxu0  ;;  %1394 = vst [vmem:[%s1671_s26 + $0xc0] sm:$0xff] %v1369_v20  }
 0x118   : > { %v619_v21 = vpop.f32.mrb[25].mxu0  ;;  %v628_v23 = vadd.f32 %v1450_v19, %v1660_v28 }
 0x119   : > { %v1451_v22 = vpop.f32.mrb[26].mxu0  ;;  %v620_v26 = vadd.f32 %v1660_v28, %v619_v21 }
 0x11a   : > { %v631_v24 = vadd.f32 %v1451_v22, %v1660_v28  ;;  %v622_v25 = vpop.f32.mrb[27].mxu0 }
 0x11b   : > { %v623_v27 = vadd.f32 %v1660_v28, %v622_v25 }
 0x11c   : > { %v1314_v29 = vpack.c.bf16 %v631_v24, %v628_v23 }
 0x11d   : > { %v1309_v30 = vpack.c.bf16 %v623_v27, %v620_v26 }
 0x11e   : > { %1383 = vst [vmem:[%s1671_s26 + $0x68] sm:$0xff] %v1314_v29  }
 0x11f   : > { %1382 = vst [vmem:[%s1671_s26 + $0x60] sm:$0xff] %v1309_v30  }
 0x120 PF: > { %s13_s14 = sadd.s32 1, %s1552_s14   ;;  %s1759_s12 = smov %s1548_s13 }
 0x121   : > { %p10_p5 = scmp.ge.s32.totalorder %s13_s14, 4   ;;  %s1760_s13 = smov %s1762_s15 }
 0x123   :  { %12 = sbr.rel (!%p10_p5) target bundleno = 2 (0x2), region = 62 }

</bundles_post_ra>
